<compile_context>
chip_gen: v5e
topology: v5e:2x2
jax: 0.10.0
libtpu: 0.0.40
codegen_flags: <defaults>
</compile_context>

<pallas_src>
import functools

import numpy as np
import jax
import jax.numpy as jnp
from jax.experimental import pallas as pl
from jax.experimental.pallas import tpu as pltpu


def _round_up(x, m):
    return ((x + m - 1) // m) * m


def _patch_proj_kernel(x_ref, w_ref, b_ref, o_ref):
    # x_ref: (TM, K)   compute-dtype patch rows (streamed per grid step)
    # w_ref: (K,  Ep)  compute-dtype projection weight (VMEM-resident)
    # b_ref: (1,  Ep)  f32 bias (VMEM-resident)
    # o_ref: (TM, Ep)  out-dtype output tile
    acc = jnp.dot(x_ref[...], w_ref[...], preferred_element_type=jnp.float32)
    o_ref[...] = (acc + b_ref[...]).astype(o_ref.dtype)


def patch_embedding(x, weight, bias, patch_size, *, tile_m=1024,
                    compute_dtype=jnp.bfloat16, out_dtype=jnp.bfloat16):
    """ViT patch embedding: Conv2d(k=s=P) + flatten(2) + transpose(1, 2).

    x: (B, C, H, W) f32.  weight: (E, C, P, P) f32.  bias: (E,) f32.
    Returns (B, num_patches, E) in `out_dtype`.
    """
    B, C, H, W = x.shape
    E = weight.shape[0]
    P = patch_size
    Hp, Wp = H // P, W // P
    num_patches = Hp * Wp
    M = B * num_patches
    K = C * P * P

    # --- glue: patchify to (M, K) in compute_dtype (half the bytes of f32).
    # allow_input_fusion below asks XLA to fuse this into the Pallas input.
    xb = x.astype(compute_dtype)
    patches = xb.reshape(B, C, Hp, P, Wp, P)
    patches = patches.transpose(0, 2, 4, 1, 3, 5).reshape(M, K)

    # conv weight (E, C, P, P) -> (K, E) so that out = patches @ w + b.
    w = weight.reshape(E, K).T.astype(compute_dtype)
    b = bias.astype(jnp.float32).reshape(1, E)

    # Pad ONLY the small weight/bias on E so the output is lane-dense; the big
    # patch matrix is never re-written for padding.
    LANE = 128
    Ep = _round_up(E, LANE)
    if Ep != E:
        w = jnp.pad(w, ((0, 0), (0, Ep - E)))
        b = jnp.pad(b, ((0, 0), (0, Ep - E)))

    # M tiling: biggest tile that makes sense, step count kept even for v7x's
    # two TensorCores when there is more than one step.
    TM = min(tile_m, _round_up(M, 8))
    grid_m = pl.cdiv(M, TM)
    if grid_m > 1 and grid_m % 2 == 1:
        TM = _round_up(pl.cdiv(M, grid_m + 1), 8)
        grid_m = pl.cdiv(M, TM)

    in_isz = np.dtype(compute_dtype).itemsize
    out_isz = np.dtype(out_dtype).itemsize

    # Scoped-VMEM budget: double-buffered patch/output tiles + resident w/b.
    vmem_needed = (2 * TM * K * in_isz          # streamed patch tiles
                   + 2 * K * Ep * in_isz        # resident weight
                   + 2 * Ep * 4                 # resident bias
                   + 2 * TM * Ep * out_isz)     # output tiles
    vmem_limit = int(min(max(2 * vmem_needed, 32 << 20), 56 << 20))

    cost = pl.CostEstimate(
        flops=2 * M * K * Ep,
        transcendentals=0,
        bytes_accessed=(M * K * in_isz + K * Ep * in_isz + Ep * 4
                        + M * Ep * out_isz),
    )

    out = pl.pallas_call(
        _patch_proj_kernel,
        out_shape=jax.ShapeDtypeStruct((M, Ep), out_dtype),
        grid_spec=pltpu.PrefetchScalarGridSpec(
            num_scalar_prefetch=0,
            grid=(grid_m,),
            in_specs=[
                pl.BlockSpec((TM, K), lambda i: (i, 0)),   # streamed patches
                pl.BlockSpec((K, Ep), lambda i: (0, 0)),   # resident weight
                pl.BlockSpec((1, Ep), lambda i: (0, 0)),   # resident bias
            ],
            out_specs=pl.BlockSpec((TM, Ep), lambda i: (i, 0)),
        ),
        compiler_params=pltpu.CompilerParams(
            # Independent M tiles: shard across both TCs on v7x; neutral on
            # single-TC v5e/v6e.
            dimension_semantics=("parallel",),
            vmem_limit_bytes=vmem_limit,
            # Let XLA fuse the patchify cast/transpose into the kernel input.
            allow_input_fusion=[True, False, False],
        ),
        cost_estimate=cost,
    )(patches, w, b)

    # Strip E padding (no-op for real ViT widths, which are multiples of 128)
    # and reshape (M, E) -> (B, num_patches, E).
    if Ep != E:
        out = out[:, :E]
    return out.reshape(B, num_patches, E)


def reference_patch_embedding(x, weight, bias, patch_size):
    """Pure-JAX reference matching nn.Conv2d(stride=kernel=P) + flatten + transpose."""
    out = jax.lax.conv_general_dilated(
        x, weight,
        window_strides=(patch_size, patch_size),
        padding="VALID",
        dimension_numbers=("NCHW", "OIHW", "NCHW"),
    )
    out = out + bias[None, :, None, None]
    B, E, Hp, Wp = out.shape
    return out.reshape(B, E, Hp * Wp).transpose(0, 2, 1)


if __name__ == "__main__":
    # Small shapes consistent with the module: img_size=16, patch_size=4,
    # in_channels=4, embed_dim=32 -> num_patches=16.
    B, C, H, W = 2, 4, 16, 16
    P = 4
    E = 32

    key = jax.random.PRNGKey(0)
    kx, kw, kb = jax.random.split(key, 3)
    x = jax.random.normal(kx, (B, C, H, W), dtype=jnp.float32)
    weight = jax.random.normal(kw, (E, C, P, P), dtype=jnp.float32) * 0.02
    bias = jax.random.normal(kb, (E,), dtype=jnp.float32) * 0.02

    fn = jax.jit(functools.partial(patch_embedding, patch_size=P))
    out = jax.block_until_ready(fn(x, weight, bias))

    ref = reference_patch_embedding(x, weight, bias, P)
    assert out.shape == (B, (H // P) * (W // P), E), out.shape
    # bf16 MXU feed + bf16 output with f32 accumulation: loosened tolerance
    # vs the f32 reference.
    assert jnp.allclose(out.astype(jnp.float32), ref, atol=3e-2, rtol=3e-2), \
        "mismatch vs reference"

    print("KERNEL_OK")
</pallas_src>

<mosaic_0001>
module attributes {stable_mosaic.version = 11 : i64} {
  func.func @_patch_proj_kernel(%arg0: i32, %arg1: memref<32x64xbf16, #tpu.memory_space<vmem>>, %arg2: memref<64x128xbf16, #tpu.memory_space<vmem>>, %arg3: memref<1x128xf32, #tpu.memory_space<vmem>>, %arg4: memref<32x128xbf16, #tpu.memory_space<vmem>>) attributes {dimension_semantics = [#tpu.dimension_semantics<parallel>], iteration_bounds = array<i64: 1>, scalar_prefetch = 0 : i64, scratch_operands = 0 : i64, tpu.core_type = #tpu.core_type<tc>, window_params = [{transform_indices = @transform_0, window_bounds = array<i64: 32, 64>}, {pipeline_mode = #tpu.pipeline_mode<synchronous>, transform_indices = @transform_1, window_bounds = array<i64: 64, 128>}, {pipeline_mode = #tpu.pipeline_mode<synchronous>, transform_indices = @transform_2, window_bounds = array<i64: 1, 128>}, {transform_indices = @transform_3, window_bounds = array<i64: 32, 128>}]} {
    %c0 = arith.constant 0 : index
    %c0_0 = arith.constant 0 : index
    %0 = vector.load %arg1[%c0, %c0_0] : memref<32x64xbf16, #tpu.memory_space<vmem>>, vector<32x64xbf16>
    %c0_1 = arith.constant 0 : index
    %c0_2 = arith.constant 0 : index
    %1 = vector.load %arg2[%c0_1, %c0_2] : memref<64x128xbf16, #tpu.memory_space<vmem>>, vector<64x128xbf16>
    %cst = arith.constant dense<0.000000e+00> : vector<32x128xf32>
    %2 = tpu.matmul %0, %1, %cst {dimension_numbers = #tpu.dot_dimension_numbers<[1], [0], [0], [1], [0, 0, 1, 1], [], []>} : vector<32x64xbf16>, vector<64x128xbf16>, vector<32x128xf32> -> vector<32x128xf32>
    %c0_3 = arith.constant 0 : index
    %c0_4 = arith.constant 0 : index
    %3 = vector.load %arg3[%c0_3, %c0_4] : memref<1x128xf32, #tpu.memory_space<vmem>>, vector<1x128xf32>
    %4 = vector.broadcast %3 : vector<1x128xf32> to vector<32x128xf32>
    %5 = arith.addf %2, %4 : vector<32x128xf32>
    %6 = arith.truncf %5 : vector<32x128xf32> to vector<32x128xbf16>
    %c0_5 = arith.constant 0 : index
    %c0_6 = arith.constant 0 : index
    %7 = vector.load %arg4[%c0_5, %c0_6] : memref<32x128xbf16, #tpu.memory_space<vmem>>, vector<32x128xbf16>
    tpu.vector_store %arg4[%c0_5, %c0_6], %6 {strides = array<i32>} : memref<32x128xbf16, #tpu.memory_space<vmem>>, vector<32x128xbf16>,
    return
  }
  func.func @transform_0(%arg0: i32) -> (i32, i32) {
    %c0_i32 = arith.constant 0 : i32
    %c0_i32_0 = arith.constant 0 : i32
    return %arg0, %c0_i32 : i32, i32
  }
  func.func @transform_1(%arg0: i32) -> (i32, i32) {
    %c0_i32 = arith.constant 0 : i32
    %c0_i32_0 = arith.constant 0 : i32
    %c0_i32_1 = arith.constant 0 : i32
    return %c0_i32, %c0_i32_0 : i32, i32
  }
  func.func @transform_2(%arg0: i32) -> (i32, i32) {
    %c0_i32 = arith.constant 0 : i32
    %c0_i32_0 = arith.constant 0 : i32
    %c0_i32_1 = arith.constant 0 : i32
    return %c0_i32, %c0_i32_0 : i32, i32
  }
  func.func @transform_3(%arg0: i32) -> (i32, i32) {
    %c0_i32 = arith.constant 0 : i32
    %c0_i32_0 = arith.constant 0 : i32
    return %arg0, %c0_i32 : i32, i32
  }
}

</mosaic_0001>

<bundles_post_ra>
// kernel: patch_embedding.1
= control target key start
LH: loop header
LB: loop body
LE: loop exit
PB: predicated region body
PF: predicated region fallthrough
CT: control target
= control target key end

     0   :  { %s242_s0 = inlined_call_operand.vmem [shape: bf16[32,64], index: 0, kind: input, shape index: {}]   ;;  %s243_s1 = inlined_call_operand.vmem [shape: bf16[64,128], index: 1, kind: input, shape index: {}]   ;;  %s244_s2 = inlined_call_operand.vmem [shape: f32[1,128], index: 2, kind: input, shape index: {}]   ;;  %s245_s3 = inlined_call_operand.hbm [shape: bf16[32,128], index: 3, kind: output, shape index: {}]  }
   0x1   :  { %v149_v0 = vld [vmem:[%s243_s1 + $0x18] sm:$0xff]  ;;  %v148_v1 = vld [vmem:[%s243_s1 + $0x10] sm:$0xff] }
   0x2   :  { %77 = vmatpush.bf16.msra.mxu0 %v149_v0  ;;  %161 = vmatpush.bf16.msra.mxu1 %v149_v0 }
   0x3   :  { %8 = vsyncpa [#allocation3], 0  ;;  %v147_v2 = vld [vmem:[%s243_s1 + $0x8] sm:$0xff]  ;;  %v146_v3 = vld [vmem:[%s243_s1] sm:$0xff]  ;;  %vm66_vm0 = vcmask 523264   ;;  %s195_s1 = smov [#allocation2]  }
   0x4   :  { %v144_v4 = vld [vmem:[%s242_s0] sm:$0xff]  ;;  %v145_v5 = vld [vmem:[%s242_s0 + $0x8] sm:$0xff]  ;;  %s104_s26 = sshll.u32 %s195_s1, 4  ;;  %s106_s29 = sshll.u32 %s245_s3, 4  ;;  %s105_s26 = int_to_ptr.vmem [resolvable:$true] %s104_s26  ;;  %s107_s29 = int_to_ptr.hbm [resolvable:$true] %s106_s29 }
   0x5   :  { %v168_v8 = vld [vmem:[%s244_s2] ss:$0 sm:$0xff]  ;;  %s196_s0 = smov 64   ;;  %s197_s2 = smov 4  }
   0x6   :  { %78 = vmatpush.bf16.msra.mxu0 %v148_v1  ;;  %162 = vmatpush.bf16.msra.mxu1 %v148_v1 }
   0xa   :  { %79 = vmatpush.bf16.msra.mxu0 %v147_v2  ;;  %163 = vmatpush.bf16.msra.mxu1 %v147_v2 }
   0xe   :  { %80 = vmatpush.bf16.msra.mxu0 %v146_v3  ;;  %164 = vmatpush.bf16.msra.mxu1 %v146_v3 }
  0x11   :  { %142 = vmatmul.msk.bf16.vlgmr.msra.gmra.mxu0 %vm66_vm0, %v144_v4  ;;  %143 = vmatmul.msk.bf16.vlgmr.msra.gmra.mxu1 %vm66_vm0, %v145_v5 }
  0x8e   :  { %v82_v6 = vpop.f32.mrf.mxu0  ;;  %v87_v7 = vpop.f32.mrf.mxu1 }
  0x8f   :  { %v83_v11 = vadd.f32 %v168_v8, %v82_v6  ;;  %v88_v12 = vadd.f32 %v168_v8, %v87_v7 }
  0x96   :  { %v84_v9 = vpop.f32.mrf.mxu0  ;;  %v89_v10 = vpop.f32.mrf.mxu1 }
  0x97   :  { %v85_v13 = vadd.f32 %v168_v8, %v84_v9  ;;  %v90_v14 = vadd.f32 %v168_v8, %v89_v10 }
  0x99   :  { %v153_v15 = vpack.c.bf16 %v85_v13, %v83_v11  ;;  %v158_v16 = vpack.c.bf16 %v90_v14, %v88_v12 }
  0x9b   :  { %154 = vst [vmem:[#allocation2] sm:$0xff] %v153_v15  }
  0x9c   :  { %160 = vst [vmem:[#allocation2 + $0x8] sm:$0xff] %v158_v16  }
  0x9d   :  { %112 = dma.vmem_to_hbm [thread:$0]  %s105_s26, 256, %s107_s29, [#allocation3], %s196_s0, %s196_s0, %s197_s2  }
  0x9e   :  { %193 = dma.done.wait [#allocation3], 256  }
  0x9f   :  { %194 = vsyncadd [#allocation3], 4294967040 }
  0xa0   :  { %117 = vsyncpa [#allocation3], 1 }

</bundles_post_ra>
